<compile_context>
chip_gen: v5e
topology: v5e:2x2
jax: 0.10.0
libtpu: 0.0.40
codegen_flags: <defaults>
</compile_context>

<pallas_src>
import functools

import jax
import jax.numpy as jnp
from jax.experimental import pallas as pl
from jax.experimental.pallas import tpu as pltpu

SUBLANE = 8  # f32 sublane height (second-to-last dim granularity)


def _round_up(n, m):
    return ((n + m - 1) // m) * m


def _sigmoid(z):
    # One EUP op (tanh) instead of exp + reciprocal; exact sigmoid.
    return 0.5 * (jnp.tanh(0.5 * z) + 1.0)


def _dot(a, b):
    # f32 accumulation on the MXU; HIGHEST precision keeps the f32 path on the
    # accurate multi-pass algorithm (bf16 inputs are unaffected).
    return jnp.dot(a, b, preferred_element_type=jnp.float32,
                   precision=jax.lax.Precision.HIGHEST)


def _mlp_kernel(x_ref, w1_ref, b1_ref, w2_ref, b2_ref, w3_ref, b3_ref, o_ref):
    # Layer 1
    h = _sigmoid(_dot(x_ref[...], w1_ref[...]) + b1_ref[...])
    # Layer 2 (activation math stays f32; only the MXU operand is cast)
    h = _sigmoid(_dot(h.astype(w2_ref.dtype), w2_ref[...]) + b2_ref[...])
    # Layer 3
    h = _sigmoid(_dot(h.astype(w3_ref.dtype), w3_ref[...]) + b3_ref[...])
    o_ref[...] = h.astype(o_ref.dtype)


def init_params(key, input_size, output_size, hidden_size):
    """nn.Linear-style uniform(-1/sqrt(fan_in), 1/sqrt(fan_in)) init.
    Weights stored [in_features, out_features] (transpose of torch layout)."""
    ks = jax.random.split(key, 6)

    def lin(kw, kb, fan_in, fan_out):
        bound = 1.0 / jnp.sqrt(jnp.float32(fan_in))
        w = jax.random.uniform(kw, (fan_in, fan_out), jnp.float32, -bound, bound)
        b = jax.random.uniform(kb, (1, fan_out), jnp.float32, -bound, bound)
        return w, b

    w1, b1 = lin(ks[0], ks[1], input_size, hidden_size)
    w2, b2 = lin(ks[2], ks[3], hidden_size, hidden_size)
    w3, b3 = lin(ks[4], ks[5], hidden_size, output_size)
    return {"w1": w1, "b1": b1, "w2": w2, "b2": b2, "w3": w3, "b3": b3}


def _batch_tile(batch, target=2048, min_steps=8):
    """Aim for large (1-2K row) tiles to amortize the ~0.35us per-step overhead,
    but keep >= min_steps grid steps on large batches so v7x's two TensorCores
    and the input/output pipeline stay fed.  Tiny batches use a single
    full-extent block (always a legal block shape)."""
    tb = min(target, _round_up(pl.cdiv(batch, min_steps), SUBLANE))
    return min(tb, batch)


@functools.partial(jax.jit, static_argnames=("use_bf16",))
def linear_model_forward(x, params, use_bf16=False):
    """x: [B, input_size] float32. Returns [B, output_size] float32."""
    w1, b1 = params["w1"], params["b1"]
    w2, b2 = params["w2"], params["b2"]
    w3, b3 = params["w3"], params["b3"]

    B, in_size = x.shape
    hidden = w1.shape[1]
    out_size = w3.shape[1]

    if use_bf16:
        # bf16 MXU operands (halves the dominant x read stream on v6e/v7x);
        # accumulation and all activation math stay f32 in-kernel.
        x = x.astype(jnp.bfloat16)
        w1, w2, w3 = (w.astype(jnp.bfloat16) for w in (w1, w2, w3))

    tb = _batch_tile(B)
    grid = (pl.cdiv(B, tb),)

    # Weights/biases: constant index_map -> fetched once, VMEM-resident.
    resident = lambda a: pl.BlockSpec(a.shape, lambda i: (0, 0))

    cost = pl.CostEstimate(
        flops=2 * B * (in_size * hidden + hidden * hidden + hidden * out_size),
        transcendentals=B * (2 * hidden + out_size),
        bytes_accessed=(x.size * x.dtype.itemsize
                        + B * out_size * 4
                        + sum(a.size * a.dtype.itemsize
                              for a in (w1, b1, w2, b2, w3, b3))),
    )

    return pl.pallas_call(
        _mlp_kernel,
        out_shape=jax.ShapeDtypeStruct((B, out_size), jnp.float32),
        grid=grid,
        in_specs=[
            pl.BlockSpec((tb, in_size), lambda i: (i, 0)),  # x: streamed tiles
            resident(w1), resident(b1),
            resident(w2), resident(b2),
            resident(w3), resident(b3),
        ],
        out_specs=pl.BlockSpec((tb, out_size), lambda i: (i, 0)),
        compiler_params=pltpu.CompilerParams(
            dimension_semantics=("parallel",),  # shard batch across TCs (v7x)
        ),
        cost_estimate=cost,
    )(x, w1, b1, w2, b2, w3, b3)


if __name__ == "__main__":
    key = jax.random.PRNGKey(0)
    k_x, k_p = jax.random.split(key)

    batch = 8
    input_size = 32
    hidden_size = 32
    output_size = 16

    x = jax.random.normal(k_x, (batch, input_size), jnp.float32)
    params = init_params(k_p, input_size, output_size, hidden_size)

    out = jax.block_until_ready(linear_model_forward(x, params))

    # Pure-JAX reference (same math as the PyTorch forward), full f32 precision.
    hp = jax.lax.Precision.HIGHEST
    h = jax.nn.sigmoid(jnp.dot(x, params["w1"], precision=hp) + params["b1"])
    h = jax.nn.sigmoid(jnp.dot(h, params["w2"], precision=hp) + params["b2"])
    ref = jax.nn.sigmoid(jnp.dot(h, params["w3"], precision=hp) + params["b3"])

    assert out.shape == (batch, output_size)
    max_err = jnp.max(jnp.abs(out - ref))
    assert max_err < 1e-5, f"max_err={max_err}"

    # bf16 input/weight path (f32 accumulation & activations): looser gate.
    out_bf16 = jax.block_until_ready(
        linear_model_forward(x, params, use_bf16=True))
    max_err_bf16 = jnp.max(jnp.abs(out_bf16 - ref))
    assert max_err_bf16 < 3e-2, f"bf16 max_err={max_err_bf16}"

    print("KERNEL_OK")
</pallas_src>

<mosaic_0001>
module attributes {stable_mosaic.version = 11 : i64} {
  func.func @_mlp_kernel(%arg0: i32, %arg1: memref<8x32xf32, #tpu.memory_space<vmem>>, %arg2: memref<32x32xf32, #tpu.memory_space<vmem>>, %arg3: memref<1x32xf32, #tpu.memory_space<vmem>>, %arg4: memref<32x32xf32, #tpu.memory_space<vmem>>, %arg5: memref<1x32xf32, #tpu.memory_space<vmem>>, %arg6: memref<32x16xf32, #tpu.memory_space<vmem>>, %arg7: memref<1x16xf32, #tpu.memory_space<vmem>>, %arg8: memref<8x16xf32, #tpu.memory_space<vmem>>) attributes {dimension_semantics = [#tpu.dimension_semantics<parallel>], iteration_bounds = array<i64: 1>, scalar_prefetch = 0 : i64, scratch_operands = 0 : i64, tpu.core_type = #tpu.core_type<tc>, window_params = [{transform_indices = @transform_0, window_bounds = array<i64: 8, 32>}, {pipeline_mode = #tpu.pipeline_mode<synchronous>, transform_indices = @transform_1, window_bounds = array<i64: 32, 32>}, {pipeline_mode = #tpu.pipeline_mode<synchronous>, transform_indices = @transform_2, window_bounds = array<i64: 1, 32>}, {pipeline_mode = #tpu.pipeline_mode<synchronous>, transform_indices = @transform_3, window_bounds = array<i64: 32, 32>}, {pipeline_mode = #tpu.pipeline_mode<synchronous>, transform_indices = @transform_4, window_bounds = array<i64: 1, 32>}, {pipeline_mode = #tpu.pipeline_mode<synchronous>, transform_indices = @transform_5, window_bounds = array<i64: 32, 16>}, {pipeline_mode = #tpu.pipeline_mode<synchronous>, transform_indices = @transform_6, window_bounds = array<i64: 1, 16>}, {transform_indices = @transform_7, window_bounds = array<i64: 8, 16>}]} {
    %c0 = arith.constant 0 : index
    %c0_0 = arith.constant 0 : index
    %0 = vector.load %arg1[%c0, %c0_0] : memref<8x32xf32, #tpu.memory_space<vmem>>, vector<8x32xf32>
    %c0_1 = arith.constant 0 : index
    %c0_2 = arith.constant 0 : index
    %1 = vector.load %arg2[%c0_1, %c0_2] : memref<32x32xf32, #tpu.memory_space<vmem>>, vector<32x32xf32>
    %cst = arith.constant dense<0.000000e+00> : vector<8x32xf32>
    %2 = tpu.matmul %0, %1, %cst {dimension_numbers = #tpu.dot_dimension_numbers<[1], [0], [0], [1], [0, 0, 1, 1], [], []>, precision = #tpu.contract_precision<fp32>} : vector<8x32xf32>, vector<32x32xf32>, vector<8x32xf32> -> vector<8x32xf32>
    %c0_3 = arith.constant 0 : index
    %c0_4 = arith.constant 0 : index
    %3 = vector.load %arg3[%c0_3, %c0_4] : memref<1x32xf32, #tpu.memory_space<vmem>>, vector<1x32xf32>
    %4 = vector.broadcast %3 : vector<1x32xf32> to vector<8x32xf32>
    %5 = arith.addf %2, %4 : vector<8x32xf32>
    %cst_5 = arith.constant 5.000000e-01 : f32
    %6 = vector.broadcast %cst_5 : f32 to vector<8x32xf32>
    %7 = arith.mulf %6, %5 : vector<8x32xf32>
    %8 = math.tanh %7 : vector<8x32xf32>
    %cst_6 = arith.constant 1.000000e+00 : f32
    %9 = vector.broadcast %cst_6 : f32 to vector<8x32xf32>
    %10 = arith.addf %8, %9 : vector<8x32xf32>
    %cst_7 = arith.constant 5.000000e-01 : f32
    %11 = vector.broadcast %cst_7 : f32 to vector<8x32xf32>
    %12 = arith.mulf %11, %10 : vector<8x32xf32>
    %c0_8 = arith.constant 0 : index
    %c0_9 = arith.constant 0 : index
    %13 = vector.load %arg4[%c0_8, %c0_9] : memref<32x32xf32, #tpu.memory_space<vmem>>, vector<32x32xf32>
    %cst_10 = arith.constant dense<0.000000e+00> : vector<8x32xf32>
    %14 = tpu.matmul %12, %13, %cst_10 {dimension_numbers = #tpu.dot_dimension_numbers<[1], [0], [0], [1], [0, 0, 1, 1], [], []>, precision = #tpu.contract_precision<fp32>} : vector<8x32xf32>, vector<32x32xf32>, vector<8x32xf32> -> vector<8x32xf32>
    %c0_11 = arith.constant 0 : index
    %c0_12 = arith.constant 0 : index
    %15 = vector.load %arg5[%c0_11, %c0_12] : memref<1x32xf32, #tpu.memory_space<vmem>>, vector<1x32xf32>
    %16 = vector.broadcast %15 : vector<1x32xf32> to vector<8x32xf32>
    %17 = arith.addf %14, %16 : vector<8x32xf32>
    %cst_13 = arith.constant 5.000000e-01 : f32
    %18 = vector.broadcast %cst_13 : f32 to vector<8x32xf32>
    %19 = arith.mulf %18, %17 : vector<8x32xf32>
    %20 = math.tanh %19 : vector<8x32xf32>
    %cst_14 = arith.constant 1.000000e+00 : f32
    %21 = vector.broadcast %cst_14 : f32 to vector<8x32xf32>
    %22 = arith.addf %20, %21 : vector<8x32xf32>
    %cst_15 = arith.constant 5.000000e-01 : f32
    %23 = vector.broadcast %cst_15 : f32 to vector<8x32xf32>
    %24 = arith.mulf %23, %22 : vector<8x32xf32>
    %c0_16 = arith.constant 0 : index
    %c0_17 = arith.constant 0 : index
    %25 = vector.load %arg6[%c0_16, %c0_17] : memref<32x16xf32, #tpu.memory_space<vmem>>, vector<32x16xf32>
    %cst_18 = arith.constant dense<0.000000e+00> : vector<8x16xf32>
    %26 = tpu.matmul %24, %25, %cst_18 {dimension_numbers = #tpu.dot_dimension_numbers<[1], [0], [0], [1], [0, 0, 1, 1], [], []>, precision = #tpu.contract_precision<fp32>} : vector<8x32xf32>, vector<32x16xf32>, vector<8x16xf32> -> vector<8x16xf32>
    %c0_19 = arith.constant 0 : index
    %c0_20 = arith.constant 0 : index
    %27 = vector.load %arg7[%c0_19, %c0_20] : memref<1x16xf32, #tpu.memory_space<vmem>>, vector<1x16xf32>
    %28 = vector.broadcast %27 : vector<1x16xf32> to vector<8x16xf32>
    %29 = arith.addf %26, %28 : vector<8x16xf32>
    %cst_21 = arith.constant 5.000000e-01 : f32
    %30 = vector.broadcast %cst_21 : f32 to vector<8x16xf32>
    %31 = arith.mulf %30, %29 : vector<8x16xf32>
    %32 = math.tanh %31 : vector<8x16xf32>
    %cst_22 = arith.constant 1.000000e+00 : f32
    %33 = vector.broadcast %cst_22 : f32 to vector<8x16xf32>
    %34 = arith.addf %32, %33 : vector<8x16xf32>
    %cst_23 = arith.constant 5.000000e-01 : f32
    %35 = vector.broadcast %cst_23 : f32 to vector<8x16xf32>
    %36 = arith.mulf %35, %34 : vector<8x16xf32>
    %c0_24 = arith.constant 0 : index
    %c0_25 = arith.constant 0 : index
    %37 = vector.load %arg8[%c0_24, %c0_25] : memref<8x16xf32, #tpu.memory_space<vmem>>, vector<8x16xf32>
    tpu.vector_store %arg8[%c0_24, %c0_25], %36 {strides = array<i32>} : memref<8x16xf32, #tpu.memory_space<vmem>>, vector<8x16xf32>,
    return
  }
  func.func @transform_0(%arg0: i32) -> (i32, i32) {
    %c0_i32 = arith.constant 0 : i32
    %c0_i32_0 = arith.constant 0 : i32
    return %arg0, %c0_i32 : i32, i32
  }
  func.func @transform_1(%arg0: i32) -> (i32, i32) {
    %c0_i32 = arith.constant 0 : i32
    %c0_i32_0 = arith.constant 0 : i32
    %c0_i32_1 = arith.constant 0 : i32
    return %c0_i32, %c0_i32_0 : i32, i32
  }
  func.func @transform_2(%arg0: i32) -> (i32, i32) {
    %c0_i32 = arith.constant 0 : i32
    %c0_i32_0 = arith.constant 0 : i32
    %c0_i32_1 = arith.constant 0 : i32
    return %c0_i32, %c0_i32_0 : i32, i32
  }
  func.func @transform_3(%arg0: i32) -> (i32, i32) {
    %c0_i32 = arith.constant 0 : i32
    %c0_i32_0 = arith.constant 0 : i32
    %c0_i32_1 = arith.constant 0 : i32
    return %c0_i32, %c0_i32_0 : i32, i32
  }
  func.func @transform_4(%arg0: i32) -> (i32, i32) {
    %c0_i32 = arith.constant 0 : i32
    %c0_i32_0 = arith.constant 0 : i32
    %c0_i32_1 = arith.constant 0 : i32
    return %c0_i32, %c0_i32_0 : i32, i32
  }
  func.func @transform_5(%arg0: i32) -> (i32, i32) {
    %c0_i32 = arith.constant 0 : i32
    %c0_i32_0 = arith.constant 0 : i32
    %c0_i32_1 = arith.constant 0 : i32
    return %c0_i32, %c0_i32_0 : i32, i32
  }
  func.func @transform_6(%arg0: i32) -> (i32, i32) {
    %c0_i32 = arith.constant 0 : i32
    %c0_i32_0 = arith.constant 0 : i32
    %c0_i32_1 = arith.constant 0 : i32
    return %c0_i32, %c0_i32_0 : i32, i32
  }
  func.func @transform_7(%arg0: i32) -> (i32, i32) {
    %c0_i32 = arith.constant 0 : i32
    %c0_i32_0 = arith.constant 0 : i32
    return %arg0, %c0_i32 : i32, i32
  }
}

</mosaic_0001>

<bundles_post_ra>
// kernel: linear_model_forward.1
= control target key start
LH: loop header
LB: loop body
LE: loop exit
PB: predicated region body
PF: predicated region fallthrough
CT: control target
= control target key end

     0   :  { %12 = vsyncpa [#allocation3], 0  ;;  %s818_s0 = inlined_call_operand.vmem [shape: f32[8,32], index: 0, kind: input, shape index: {}]   ;;  %s819_s1 = inlined_call_operand.vmem [shape: f32[32,32], index: 1, kind: input, shape index: {}]   ;;  %s820_s2 = inlined_call_operand.vmem [shape: f32[1,32], index: 2, kind: input, shape index: {}]   ;;  %s821_s3 = inlined_call_operand.hbm [shape: f32[32,32], index: 3, kind: input, shape index: {}]   ;;  %s822_s4 = inlined_call_operand.vmem [shape: f32[1,32], index: 4, kind: input, shape index: {}]   ;;  %s823_s5 = inlined_call_operand.vmem [shape: f32[32,16], index: 5, kind: input, shape index: {}]   ;;  %s824_s6 = inlined_call_operand.vmem [shape: f32[1,16], index: 6, kind: input, shape index: {}]   ;;  %s825_s7 = inlined_call_operand.hbm [shape: f32[8,16], index: 7, kind: output, shape index: {}]  }
   0x1   :  { %13 = vsyncpa [#allocation4], 0  ;;  %s24_s26 = sshll.u32 %s821_s3, 4  ;;  %s729_s27 = smov [#allocation2]   ;;  %s25_s26 = int_to_ptr.hbm [resolvable:$true] %s24_s26 }
   0x2   :  { %s26_s28 = sshll.u32 %s729_s27, 4  ;;  %s730_s29 = smov 128   ;;  %s27_s28 = int_to_ptr.vmem [resolvable:$true] %s26_s28 }
   0x3   :  { %s731_s30 = smov 8  }
   0x4   :  { %32 = dma.hbm_to_vmem [thread:$0]  %s25_s26, 512, %s27_s28, [#allocation3], %s730_s29, %s730_s29, %s731_s30  }
   0x5   :  { %725 = dma.done.wait [#allocation3], 512  }
   0x6   :  { %726 = vsyncadd [#allocation3], 4294966784  ;;  %vm52_vm0 = vcmask 261120   ;;  %v47_v0 = vld [vmem:[%s819_s1 + $0x18] sm:$0xff]  ;;  %v46_v1 = vld [vmem:[%s819_s1 + $0x10] sm:$0xff]  ;;  %s732_s26 = smov [#allocation5]  }
   0x7   :  { %v45_v2 = vld [vmem:[%s819_s1 + $0x8] sm:$0xff]  ;;  %v68_v3 = vand.u32 4294901760, %v47_v0  ;;  %v70_v4 = vand.u32 4294901760, %v46_v1  ;;  %v44_v6 = vld [vmem:[%s819_s1] sm:$0xff]  ;;  %v248_v31 = vld [vmem:[#allocation2 + $0x18] sm:$0xff]  ;;  %s652_s27 = sshll.u32 %s732_s26, 4  ;;  %s653_s27 = int_to_ptr.vmem [resolvable:$true] %s652_s27 }
   0x8   :  { %v72_v5 = vand.u32 4294901760, %v45_v2  ;;  %v43_v7 = vld [vmem:[%s818_s0] sm:$0xff]  ;;  %v74_v8 = vand.u32 4294901760, %v44_v6  ;;  %v268_v32 = vand.u32 4294901760, %v248_v31  ;;  %v247_v33 = vld [vmem:[#allocation2 + $0x10] sm:$0xff]  ;;  %v246_v36 = vld [vmem:[#allocation2 + $0x8] sm:$0xff] }
   0x9   :  { %v54_v9 = vsel %vm52_vm0, %v43_v7, 0  ;;  %v98_v10 = vsub.f32 %v47_v0, %v68_v3  ;;  %69 = vmatpush.msra.mxu0 %v68_v3  ;;  %v104_v11 = vsub.f32 %v46_v1, %v70_v4  ;;  %169 = vmatpush.msra.mxu3 %v68_v3  ;;  %v270_v35 = vand.u32 4294901760, %v247_v33  ;;  %v245_v40 = vld [vmem:[#allocation2] sm:$0xff] }
   0xa   :  { %v110_v12 = vsub.f32 %v45_v2, %v72_v5  ;;  %v76_v13 = vand.u32 4294901760, %v54_v9  ;;  %v116_v14 = vsub.f32 %v44_v6, %v74_v8  ;;  %v298_v34 = vsub.f32 %v248_v31, %v268_v32  ;;  %v668_v55 = vld [vmem:[%s820_s2] ss:$0 sm:$0xff] }
   0xb   :  { %140 = vmatpush.msra.mxu2 %v98_v10  ;;  %71 = vmatpush.msra.mxu0 %v70_v4  ;;  %v99_v15 = vand.u32 4294901760, %v98_v10  ;;  %v105_v16 = vand.u32 4294901760, %v104_v11  ;;  %v304_v38 = vsub.f32 %v247_v33, %v270_v35  ;;  %v272_v39 = vand.u32 4294901760, %v246_v36 }
   0xc   :  { %v77_v17 = vsub.f32 %v54_v9, %v76_v13  ;;  %v111_v18 = vand.u32 4294901760, %v110_v12  ;;  %171 = vmatpush.msra.mxu3 %v70_v4  ;;  %v117_v19 = vand.u32 4294901760, %v116_v14  ;;  %v299_v37 = vand.u32 4294901760, %v298_v34 }
   0xd   :  { %143 = vmatpush.msra.mxu2 %v104_v11  ;;  %v100_v20 = vsub.f32 %v98_v10, %v99_v15  ;;  %73 = vmatpush.msra.mxu0 %v72_v5  ;;  %v106_v21 = vsub.f32 %v104_v11, %v105_v16  ;;  %v305_v42 = vand.u32 4294901760, %v304_v38  ;;  %v310_v43 = vsub.f32 %v246_v36, %v272_v39 }
   0xe   :  { %v112_v22 = vsub.f32 %v110_v12, %v111_v18  ;;  %v78_v23 = vand.u32 4294901760, %v77_v17  ;;  %173 = vmatpush.msra.mxu3 %v72_v5  ;;  %v118_v27 = vsub.f32 %v116_v14, %v117_v19  ;;  %v300_v41 = vsub.f32 %v298_v34, %v299_v37 }
   0xf   :  { %v101_v24 = vand.u32 4294901760, %v100_v20  ;;  %146 = vmatpush.msra.mxu2 %v110_v12  ;;  %v107_v25 = vand.u32 4294901760, %v106_v21  ;;  %75 = vmatpush.msra.mxu0 %v74_v8  ;;  %v274_v44 = vand.u32 4294901760, %v245_v40  ;;  %v306_v46 = vsub.f32 %v304_v38, %v305_v42 }
  0x10   :  { %v79_v26 = vsub.f32 %v77_v17, %v78_v23  ;;  %175 = vmatpush.msra.mxu3 %v74_v8  ;;  %v113_v28 = vand.u32 4294901760, %v112_v22  ;;  %v119_v30 = vand.u32 4294901760, %v118_v27  ;;  %v301_v45 = vand.u32 4294901760, %v300_v41 }
  0x11   :  { %198 = vmatpush.msrb.mxu0 %v99_v15  ;;  %102 = vmatpush.msra.mxu1 %v101_v24  ;;  %v311_v47 = vand.u32 4294901760, %v310_v43  ;;  %v316_v48 = vsub.f32 %v245_v40, %v274_v44  ;;  %v307_v49 = vand.u32 4294901760, %v306_v46  ;;  %vm645_vm1 = vcmask 130048  }
  0x12   :  { %149 = vmatpush.msra.mxu2 %v116_v14  ;;  %v80_v29 = vand.u32 4294901760, %v79_v26  ;;  %179 = vmatmul.f32.vlgmr.msra.gmra.mxu3 %v78_v23  ;;  %v448_v14 = vld [vmem:[%s823_s5 + $0x18] sm:$0xff]  ;;  %v445_v23 = vld [vmem:[%s823_s5] sm:$0xff] }
  0x13   :  { %152 = vmatmul.f32.vlgmr.msra.gmra.mxu2 %v77_v17  ;;  %108 = vmatpush.msra.mxu1 %v107_v25  ;;  %v312_v50 = vsub.f32 %v310_v43, %v311_v47  ;;  %v317_v51 = vand.u32 4294901760, %v316_v48  ;;  %v468_v15 = vand.u32 4294901760, %v448_v14  ;;  %v474_v27 = vand.u32 4294901760, %v445_v23 }
  0x14   :  { %81 = vmatmul.f32.vlgmr.msra.gmra.mxu0 %v80_v29  ;;  %269 = vmatpush.msrb.mxu2 %v268_v32 }
  0x15   :  { %202 = vmatpush.msrb.mxu0 %v105_v16  ;;  %114 = vmatpush.msra.mxu1 %v113_v28  ;;  %v313_v52 = vand.u32 4294901760, %v312_v50  ;;  %v318_v53 = vsub.f32 %v316_v48, %v317_v51  ;;  %v447_v16 = vld [vmem:[%s823_s5 + $0x10] sm:$0xff]  ;;  %v498_v17 = vsub.f32 %v448_v14, %v468_v15  ;;  %v516_v31 = vsub.f32 %v445_v23, %v474_v27 }
  0x16   :  { %271 = vmatpush.msrb.mxu2 %v270_v35  ;;  %302 = vmatpush.msrb.mxu3 %v301_v45 }
  0x17   :  { %206 = vmatpush.msrb.mxu0 %v111_v18  ;;  %120 = vmatpush.msra.mxu1 %v119_v30  ;;  %v319_v54 = vand.u32 4294901760, %v318_v53  ;;  %v470_v18 = vand.u32 4294901760, %v447_v16  ;;  %v499_v20 = vand.u32 4294901760, %v498_v17 }
  0x18   :  { %122 = vmatmul.f32.vlgmr.msra.gmra.mxu1 %v76_v13  ;;  %273 = vmatpush.msrb.mxu2 %v272_v39 }
  0x19   :  { %210 = vmatpush.msrb.mxu0 %v117_v19  ;;  %229 = vmatpush.msrb.mxu1 %v68_v3  ;;  %v446_v19 = vld [vmem:[%s823_s5 + $0x8] sm:$0xff]  ;;  %v504_v21 = vsub.f32 %v447_v16, %v470_v18  ;;  %v500_v24 = vsub.f32 %v498_v17, %v499_v20 }
  0x1a   :  { %275 = vmatpush.msrb.mxu2 %v274_v44  ;;  %308 = vmatpush.msrb.mxu3 %v307_v49  ;;  %v472_v22 = vand.u32 4294901760, %v446_v19 }
  0x1b   :  { %231 = vmatpush.msrb.mxu1 %v70_v4  ;;  %340 = vmatpush.msra.mxu0 %v298_v34  ;;  %v505_v25 = vand.u32 4294901760, %v504_v21  ;;  %v501_v28 = vand.u32 4294901760, %v500_v24  ;;  %v517_v34 = vand.u32 4294901760, %v516_v31 }
  0x1c   :  { %212 = vmatmul.f32.vlgmr.msrb.gmra.mxu0 %v76_v13  ;;  %398 = vmatpush.msra.mxu2 %v299_v37  ;;  %v510_v26 = vsub.f32 %v446_v19, %v472_v22 }
  0x1d   :  { %233 = vmatpush.msrb.mxu1 %v72_v5  ;;  %343 = vmatpush.msra.mxu0 %v304_v38  ;;  %v506_v29 = vsub.f32 %v504_v21, %v505_v25  ;;  %v518_v36 = vsub.f32 %v516_v31, %v517_v34  ;;  %v669_v38 = vld [vmem:[%s822_s4] ss:$0 sm:$0xff] }
  0x1e   :  { %402 = vmatpush.msra.mxu2 %v305_v42  ;;  %314 = vmatpush.msrb.mxu3 %v313_v52  ;;  %v511_v30 = vand.u32 4294901760, %v510_v26 }
  0x1f   :  { %235 = vmatpush.msrb.mxu1 %v74_v8  ;;  %346 = vmatpush.msra.mxu0 %v310_v43  ;;  %v519_v37 = vand.u32 4294901760, %v518_v36 }
  0x20   :  { %237 = vmatmul.f32.vlgmr.msrb.gmra.mxu1 %v76_v13  ;;  %406 = vmatpush.msra.mxu2 %v311_v47  ;;  %v512_v33 = vsub.f32 %v510_v26, %v511_v30 }
  0x21   :  { %369 = vmatpush.msra.mxu1 %v268_v32  ;;  %349 = vmatpush.msra.mxu0 %v316_v48 }
  0x22   :  { %320 = vmatpush.msrb.mxu3 %v319_v54  ;;  %410 = vmatpush.msra.mxu2 %v317_v51 }
  0x23   :  { %371 = vmatpush.msra.mxu1 %v270_v35  ;;  %469 = vmatpush.msrb.mxu0 %v468_v15 }
  0x24   :  { %429 = vmatpush.msra.mxu3 %v268_v32  ;;  %v507_v32 = vand.u32 4294901760, %v506_v29 }
  0x25   :  { %373 = vmatpush.msra.mxu1 %v272_v39  ;;  %471 = vmatpush.msrb.mxu0 %v470_v18 }
  0x26   :  { %431 = vmatpush.msra.mxu3 %v270_v35  ;;  %v513_v35 = vand.u32 4294901760, %v512_v33 }
  0x27   :  { %375 = vmatpush.msra.mxu1 %v274_v44  ;;  %473 = vmatpush.msrb.mxu0 %v472_v22 }
  0x28   :  { %433 = vmatpush.msra.mxu3 %v272_v39 }
  0x29   :  { %475 = vmatpush.msrb.mxu0 %v474_v27  ;;  %502 = vmatpush.msrb.mxu1 %v501_v28 }
  0x2a   :  { %435 = vmatpush.msra.mxu3 %v274_v44 }
  0x2b   :  { %508 = vmatpush.msrb.mxu1 %v507_v32 }
  0x2d   :  { %514 = vmatpush.msrb.mxu1 %v513_v35 }
  0x2f   :  { %520 = vmatpush.msrb.mxu1 %v519_v37 }
  0x91   :  { %v82_v56 = vpop.f32.mrf.mxu0 }
  0x92   :  { %v83_v57 = vadd.f32 %v668_v55, %v82_v56 }
  0x95   :  { %v123_v58 = vpop.f32.mrf.mxu1  ;;  %v180_v61 = vpop.f32.mrf.mxu3 }
  0x96   :  { %v153_v59 = vpop.f32.mrf.mxu2  ;;  %v124_v60 = vadd.f32 %v123_v58, %v83_v57 }
  0x98   :  { %v154_v62 = vadd.f32 %v153_v59, %v124_v60 }
  0x99   :  { %v213_v63 = vpop.f32.mrf.mxu0 }
  0x9a   :  { %v181_v0 = vadd.f32 %v180_v61, %v154_v62  ;;  %v670_v61 = vld [vmem:[%s824_s6] ss:$0 sm:$0xff]  ;;  %s654_s6 = sshll.u32 %s825_s7, 4  ;;  %s655_s6 = int_to_ptr.hbm [resolvable:$true] %s654_s6 }
  0x9c   :  { %v214_v1 = vadd.f32 %v213_v63, %v181_v0 }
  0x9d   :  { %v238_v2 = vpop.f32.mrf.mxu1 }
  0x9e   :  { %v239_v3 = vadd.f32 %v238_v2, %v214_v1 }
  0xa0   :  { %v241_v4 = vmul.f32 0.5, %v239_v3 }
  0xa2   :  { %671 = vtanh.f32 %v241_v4 }
  0xa8   :  { %v672_v5 = vpop.eup %671 }
  0xa9   :  { %v243_v6 = vadd.f32 1.0, %v672_v5 }
  0xab   :  { %v244_v7 = vmul.f32 0.5, %v243_v6 }
  0xad   :  { %v254_v8 = vsel %vm52_vm0, %v244_v7, 0 }
  0xae   :  { %v276_v9 = vand.u32 4294901760, %v254_v8 }
  0xb0   :  { %v277_v10 = vsub.f32 %v254_v8, %v276_v9  ;;  %322 = vmatmul.f32.vlgmr.msrb.gmra.mxu3 %v276_v9 }
  0xb1   :  { %569 = vmatpush.msrb.mxu3 %v468_v15 }
  0xb2   :  { %352 = vmatmul.f32.vlgmr.msra.gmra.mxu0 %v277_v10  ;;  %v278_v11 = vand.u32 4294901760, %v277_v10 }
  0xb3   :  { %571 = vmatpush.msrb.mxu3 %v470_v18  ;;  %598 = vmatpush.msra.mxu0 %v499_v20 }
  0xb4   :  { %379 = vmatmul.f32.vlgmr.msra.gmra.mxu1 %v278_v11  ;;  %v279_v12 = vsub.f32 %v277_v10, %v278_v11 }
  0xb5   :  { %573 = vmatpush.msrb.mxu3 %v472_v22  ;;  %602 = vmatpush.msra.mxu0 %v505_v25 }
  0xb6   :  { %v280_v13 = vand.u32 4294901760, %v279_v12  ;;  %629 = vmatpush.msra.mxu1 %v468_v15 }
  0xb7   :  { %575 = vmatpush.msrb.mxu3 %v474_v27  ;;  %606 = vmatpush.msra.mxu0 %v511_v30 }
  0xb8   :  { %281 = vmatmul.f32.vlgmr.msrb.gmra.mxu2 %v280_v13  ;;  %437 = vmatmul.f32.vlgmr.msra.gmra.mxu3 %v276_v9 }
  0xb9   :  { %540 = vmatpush.msrb.mxu2 %v498_v17  ;;  %610 = vmatpush.msra.mxu0 %v517_v34 }
  0xba   :  { %631 = vmatpush.msra.mxu1 %v470_v18 }
  0xbb   :  { %543 = vmatpush.msrb.mxu2 %v504_v21 }
  0xbc   :  { %633 = vmatpush.msra.mxu1 %v472_v22 }
  0xbd   :  { %546 = vmatpush.msrb.mxu2 %v510_v26 }
  0xbe   :  { %635 = vmatpush.msra.mxu1 %v474_v27 }
  0xbf   :  { %549 = vmatpush.msrb.mxu2 %v516_v31 }
  0xc0   :  { %412 = vmatmul.f32.vlgmr.msra.gmra.mxu2 %v276_v9 }
 0x12f   :  { %v353_v43 = vpop.f32.mrf.mxu0 }
 0x131   :  { %v380_v45 = vpop.f32.mrf.mxu1 }
 0x133   :  { %v323_v39 = vpop.f32.mrf.mxu3 }
 0x13b   :  { %v282_v40 = vpop.f32.mrf.mxu2  ;;  %v438_v49 = vpop.f32.mrf.mxu3 }
 0x13c   :  { %v283_v41 = vadd.f32 %v669_v38, %v282_v40 }
 0x13e   :  { %v324_v42 = vadd.f32 %v323_v39, %v283_v41 }
 0x140   :  { %v354_v44 = vadd.f32 %v353_v43, %v324_v42 }
 0x142   :  { %v381_v46 = vadd.f32 %v380_v45, %v354_v44 }
 0x143   :  { %v413_v47 = vpop.f32.mrf.mxu2 }
 0x144   :  { %v414_v48 = vadd.f32 %v413_v47, %v381_v46 }
 0x146   :  { %v439_v50 = vadd.f32 %v438_v49, %v414_v48 }
 0x148   :  { %v441_v51 = vmul.f32 0.5, %v439_v50 }
 0x14a   :  { %673 = vtanh.f32 %v441_v51 }
 0x150   :  { %v674_v52 = vpop.eup %673 }
 0x151   :  { %v443_v53 = vadd.f32 1.0, %v674_v52 }
 0x153   :  { %v444_v54 = vmul.f32 0.5, %v443_v53 }
 0x155   :  { %v454_v55 = vsel %vm52_vm0, %v444_v54, 0 }
 0x156   :  { %v476_v56 = vand.u32 4294901760, %v454_v55 }
 0x158   :  { %522 = vmatmul.f32.vlgmr.msrb.gmra.mxu1 %v476_v56  ;;  %v477_v57 = vsub.f32 %v454_v55, %v476_v56 }
 0x15a   :  { %552 = vmatmul.f32.vlgmr.msrb.gmra.mxu2 %v477_v57  ;;  %v478_v58 = vand.u32 4294901760, %v477_v57 }
 0x15c   :  { %579 = vmatmul.f32.vlgmr.msrb.gmra.mxu3 %v478_v58  ;;  %v479_v59 = vsub.f32 %v477_v57, %v478_v58 }
 0x15e   :  { %v480_v60 = vand.u32 4294901760, %v479_v59 }
 0x160   :  { %481 = vmatmul.f32.vlgmr.msrb.gmra.mxu0 %v480_v60  ;;  %637 = vmatmul.f32.vlgmr.msra.gmra.mxu1 %v476_v56 }
 0x168   :  { %612 = vmatmul.f32.vlgmr.msra.gmra.mxu0 %v476_v56 }
 0x1d5   :  { %v523_v62 = vpop.f32.mrf.mxu1 }
 0x1dd   :  { %v482_v63 = vpop.f32.mrf.mxu0  ;;  %v553_v2 = vpop.f32.mrf.mxu2 }
 0x1de   :  { %v483_v0 = vadd.f32 %v670_v61, %v482_v63  ;;  %v638_v8 = vpop.f32.mrf.mxu1 }
 0x1df   :  { %v580_v4 = vpop.f32.mrf.mxu3 }
 0x1e0   :  { %v524_v1 = vadd.f32 %v523_v62, %v483_v0 }
 0x1e2   :  { %v554_v3 = vadd.f32 %v553_v2, %v524_v1 }
 0x1e4   :  { %v581_v5 = vadd.f32 %v580_v4, %v554_v3 }
 0x1e5   :  { %v613_v6 = vpop.f32.mrf.mxu0 }
 0x1e6   :  { %v614_v7 = vadd.f32 %v613_v6, %v581_v5 }
 0x1e8   :  { %v639_v9 = vadd.f32 %v638_v8, %v614_v7 }
 0x1ea   :  { %v641_v10 = vmul.f32 0.5, %v639_v9 }
 0x1ec   :  { %675 = vtanh.f32 %v641_v10 }
 0x1f2   :  { %v676_v11 = vpop.eup %675 }
 0x1f3   :  { %v643_v12 = vadd.f32 1.0, %v676_v11 }
 0x1f5   :  { %v644_v13 = vmul.f32 0.5, %v643_v12 }
 0x1f7   :  { %646 = vst.msk [vmem:[#allocation5] sm:$0xff] %vm645_vm1, %v644_v13 }
 0x1f8   :  { %657 = dma.vmem_to_hbm [thread:$0]  %s653_s27, 128, %s655_s6, [#allocation4]  }
 0x1f9   :  { %727 = dma.done.wait [#allocation4], 128  }
 0x1fa   :  { %728 = vsyncadd [#allocation4], 4294967168 }
 0x1fb   :  { %662 = vsyncpa [#allocation3], 1 }
 0x1fc   :  { %663 = vsyncpa [#allocation4], 1 }

</bundles_post_ra>
